<compile_context>
chip_gen: v7x
topology: tpu7x:2x2x1
jax: 0.10.0
libtpu: 0.0.40
codegen_flags: <defaults>
</compile_context>

<pallas_src>
import jax
import jax.numpy as jnp
from jax import lax
from jax.experimental import pallas as pl
from jax.experimental.pallas import tpu as pltpu


def _pwdp_kernel(x_ref, k_ref, o_ref):
    # x_ref: (1, c, THW), k_ref: (1, cout, c), o_ref: (1, cout, THW)
    x = x_ref[0]   # (c, THW)
    k = k_ref[0]   # (cout, c)
    # (cout, c) @ (c, THW) on the MXU, f32 accumulation.  Contraction written
    # explicitly so no transpose of K can materialize.
    y = lax.dot_general(
        k, x,
        dimension_numbers=(((1,), (0,)), ((), ())),
        preferred_element_type=jnp.float32,
    )
    o_ref[0] = y.astype(o_ref.dtype)


def _vmem_capacity_bytes():
    """Physical VMEM per core; conservative (v7x, 64 MiB) fallback."""
    try:
        return int(pltpu.get_tpu_info().vmem_capacity_bytes)
    except Exception:  # query unavailable (e.g. CPU interpret) -> be safe
        return 64 << 20


def _pick_hw_tile(hw, c, cout, itemsize, n, budget_bytes):
    """Pick the hw (lane) tile:
      * multiple of 128 and >= 512 (lane-dense, unmasked vst / long DMA rows),
      * double-buffered x + out tiles plus resident (double-buffered) K fit in
        budget_bytes,
      * capped at 4096 lanes (diminishing returns) and, when n <= 2, capped so
        the hw grid axis keeps >= ~4 steps (v7x megacore needs steps to shard),
      * NO divisibility requirement: the grid uses pl.cdiv and Pallas masks
        the partial last block.
    Small hw (<= 512) uses a single full-extent block (always legal)."""
    if hw <= 512:
        return hw
    k_bytes = 2 * cout * c * itemsize            # resident K, double-buffered
    per_lane = 2 * (c + cout) * itemsize         # x + out tiles, double-buffered
    max_t = (budget_bytes - k_bytes) // per_lane
    max_t = max(512, (max_t // 128) * 128)
    if n <= 2:
        # keep >= ~4 hw steps so both v7x TensorCores get work
        max_t = min(max_t, max(512, ((hw // 4) // 128) * 128))
    max_t = min(max_t, 4096)
    # at most one partial block: never exceed the 128-aligned extent of hw
    max_t = min(max_t, (hw // 128) * 128)        # >= 512 since hw > 512
    return max_t


def pixelwise_dot_product(x, K):
    """x: (n, c, h, w), K: (n, cout, c) -> (n, cout, h, w)."""
    n, c, h, w = x.shape
    _, cout, ck = K.shape
    assert c == ck, "channel / embedding dim mismatch"
    hw = h * w
    itemsize = jnp.dtype(x.dtype).itemsize

    # Free reshape of NCHW — no transpose, no extra HBM traffic.
    x_flat = x.reshape(n, c, hw)

    # Generation-aware VMEM sizing (v7x: 64 MiB physical; v5e/v6e: 128 MiB).
    vmem_cap = _vmem_capacity_bytes()
    budget = min(24 << 20, vmem_cap // 3)                  # working-set budget
    vmem_limit = int(min(64 << 20, (vmem_cap * 3) // 4))   # leave Mosaic headroom

    thw = _pick_hw_tile(hw, c, cout, itemsize, n, budget)
    grid = (n, pl.cdiv(hw, thw))

    cost = pl.CostEstimate(
        flops=2 * n * cout * c * hw,
        transcendentals=0,
        bytes_accessed=itemsize * (n * c * hw + n * cout * hw + n * cout * c),
    )

    out_flat = pl.pallas_call(
        _pwdp_kernel,
        out_shape=jax.ShapeDtypeStruct((n, cout, hw), x.dtype),
        grid_spec=pltpu.PrefetchScalarGridSpec(
            num_scalar_prefetch=0,
            grid=grid,
            in_specs=[
                # x tile: (1, c, THW), walks the hw axis (partial last block masked).
                pl.BlockSpec((1, c, thw), lambda b, t: (b, 0, t)),
                # K tile: resident across the hw axis (same block for all t).
                pl.BlockSpec((1, cout, c), lambda b, t: (b, 0, 0)),
            ],
            # Output is NCHW-flat: (n, cout, hw), lane-dense on hw.
            out_specs=pl.BlockSpec((1, cout, thw), lambda b, t: (b, 0, t)),
        ),
        compiler_params=pltpu.CompilerParams(
            # No reduction axis: c is contracted entirely inside one block.
            dimension_semantics=("parallel", "parallel"),
            vmem_limit_bytes=vmem_limit,
        ),
        cost_estimate=cost,
    )(x_flat, K)

    # Free reshape back to NCHW.
    return out_flat.reshape(n, cout, h, w)


if __name__ == "__main__":
    key = jax.random.PRNGKey(0)
    kx, kk = jax.random.split(key)

    # 1) Small shapes consistent with the module's forward (hw = 256: single
    #    full-extent block).
    n, c, h, w = 2, 4, 16, 16
    cout = 8
    x = jax.random.normal(kx, (n, c, h, w), dtype=jnp.float32)
    K = jax.random.normal(kk, (n, cout, c), dtype=jnp.float32)
    out = jax.block_until_ready(pixelwise_dot_product(x, K))
    ref = jnp.einsum("nchw,noc->nohw", x, K)
    assert out.shape == (n, cout, h, w)
    assert jnp.allclose(out, ref, atol=1e-5, rtol=1e-5)

    # 2) Non-128-aligned tiny hw (36): single full-extent block path.
    x2 = jax.random.normal(kx, (1, c, 6, 6), dtype=jnp.float32)
    K2 = jax.random.normal(kk, (1, cout, c), dtype=jnp.float32)
    out2 = jax.block_until_ready(pixelwise_dot_product(x2, K2))
    ref2 = jnp.einsum("nchw,noc->nohw", x2, K2)
    assert jnp.allclose(out2, ref2, atol=1e-5, rtol=1e-5)

    # 3) hw = 660 (not a multiple of the tile): exercises the cdiv grid with a
    #    masked partial last hw block.
    x3 = jax.random.normal(kx, (1, c, 20, 33), dtype=jnp.float32)
    K3 = jax.random.normal(kk, (1, cout, c), dtype=jnp.float32)
    out3 = jax.block_until_ready(pixelwise_dot_product(x3, K3))
    ref3 = jnp.einsum("nchw,noc->nohw", x3, K3)
    assert jnp.allclose(out3, ref3, atol=1e-5, rtol=1e-5)

    # 4) bf16 I/O (halves HBM traffic for this bandwidth-bound op); f32 MXU
    #    accumulation inside the kernel, bf16 output cast.
    xb = x.astype(jnp.bfloat16)
    Kb = K.astype(jnp.bfloat16)
    outb = jax.block_until_ready(pixelwise_dot_product(xb, Kb))
    refb = jnp.einsum("nchw,noc->nohw",
                      xb.astype(jnp.float32), Kb.astype(jnp.float32))
    assert outb.dtype == jnp.bfloat16
    assert jnp.allclose(outb.astype(jnp.float32), refb, atol=2e-2, rtol=2e-2)

    print("KERNEL_OK")
</pallas_src>

<mosaic_0001>
module attributes {stable_mosaic.version = 11 : i64} {
  func.func @_pwdp_kernel(%arg0: i32, %arg1: i32, %arg2: memref<1x4x256xf32, #tpu.memory_space<vmem>>, %arg3: memref<1x8x4xf32, #tpu.memory_space<vmem>>, %arg4: memref<1x8x256xf32, #tpu.memory_space<vmem>>) attributes {dimension_semantics = [#tpu.dimension_semantics<parallel>, #tpu.dimension_semantics<parallel>], iteration_bounds = array<i64: 2, 1>, scalar_prefetch = 0 : i64, scratch_operands = 0 : i64, tpu.core_type = #tpu.core_type<tc>, window_params = [{transform_indices = @transform_0, window_bounds = array<i64: 1, 4, 256>}, {transform_indices = @transform_1, window_bounds = array<i64: 1, 8, 4>}, {transform_indices = @transform_2, window_bounds = array<i64: 1, 8, 256>}]} {
    %c0 = arith.constant 0 : index
    %c0_0 = arith.constant 0 : index
    %c0_1 = arith.constant 0 : index
    %0 = vector.load %arg2[%c0, %c0_0, %c0_1] : memref<1x4x256xf32, #tpu.memory_space<vmem>>, vector<1x4x256xf32>
    %1 = vector.shape_cast %0 : vector<1x4x256xf32> to vector<4x256xf32>
    %c0_2 = arith.constant 0 : index
    %c0_3 = arith.constant 0 : index
    %c0_4 = arith.constant 0 : index
    %2 = vector.load %arg3[%c0_2, %c0_3, %c0_4] : memref<1x8x4xf32, #tpu.memory_space<vmem>>, vector<1x8x4xf32>
    %3 = vector.shape_cast %2 : vector<1x8x4xf32> to vector<8x4xf32>
    %cst = arith.constant dense<0.000000e+00> : vector<8x256xf32>
    %4 = tpu.matmul %3, %1, %cst {dimension_numbers = #tpu.dot_dimension_numbers<[1], [0], [0], [1], [0, 0, 1, 1], [], []>} : vector<8x4xf32>, vector<4x256xf32>, vector<8x256xf32> -> vector<8x256xf32>
    %c0_5 = arith.constant 0 : index
    %c0_6 = arith.constant 0 : index
    %c0_7 = arith.constant 0 : index
    %5 = vector.load %arg4[%c0_5, %c0_6, %c0_7] : memref<1x8x256xf32, #tpu.memory_space<vmem>>, vector<1x8x256xf32>
    %6 = vector.shape_cast %5 : vector<1x8x256xf32> to vector<8x256xf32>
    %7 = vector.shape_cast %4 : vector<8x256xf32> to vector<1x8x256xf32>
    tpu.vector_store %arg4[%c0_5, %c0_6, %c0_7], %7 {strides = array<i32>} : memref<1x8x256xf32, #tpu.memory_space<vmem>>, vector<1x8x256xf32>,
    return
  }
  func.func @transform_0(%arg0: i32, %arg1: i32) -> (i32, i32, i32) {
    %c0_i32 = arith.constant 0 : i32
    %c0_i32_0 = arith.constant 0 : i32
    return %arg0, %c0_i32, %arg1 : i32, i32, i32
  }
  func.func @transform_1(%arg0: i32, %arg1: i32) -> (i32, i32, i32) {
    %c0_i32 = arith.constant 0 : i32
    %c0_i32_0 = arith.constant 0 : i32
    %c0_i32_1 = arith.constant 0 : i32
    return %arg0, %c0_i32, %c0_i32_0 : i32, i32, i32
  }
  func.func @transform_2(%arg0: i32, %arg1: i32) -> (i32, i32, i32) {
    %c0_i32 = arith.constant 0 : i32
    %c0_i32_0 = arith.constant 0 : i32
    return %arg0, %c0_i32, %arg1 : i32, i32, i32
  }
}

</mosaic_0001>

<bundles_post_ra>
// kernel: tpu_custom_call.1
= control target key start
LH: loop header
LB: loop body
LE: loop exit
PB: predicated region body
PF: predicated region fallthrough
CT: control target
= control target key end

     0   :  { %7 = vsyncpa [#allocation3], 0  ;;  %s669_s0 = inlined_call_operand.vmem [shape: f32[2,4,256], index: 0, kind: input, shape index: {}]   ;;  %s670_s1 = inlined_call_operand.vmem [shape: f32[2,8,4], index: 1, kind: input, shape index: {}]   ;;  %s671_s2 = inlined_call_operand.hbm [shape: f32[2,8,256], index: 2, kind: output, shape index: {}]  }
   0x1   :  { %9 = vsyncpa [#allocation3 + $0x1], 0  ;;  %s554_s9 = smov 0   ;;  %s556_s10 = smov 0  }
   0x2   :  { %s558_s11 = smov 0   ;;  %s560_s12 = smov 0  }
   0x3   :  { %s562_s13 = smov 0   ;;  %s564_s14 = smov 0  }
   0x4 LB: > { %s381_s15 = sadd.s32 4294967295, %s535_s14   ;;  %s382_s16 = sadd.s32 4294967294, %s535_s14   ;;  %s535_s14 = sphi %s564_s14, %s15_s14   ;;  %s531_s13 = sphi %s562_s13, %s678_s13   ;;  %s527_s12 = sphi %s560_s12, %s677_s12   ;;  %s523_s11 = sphi %s558_s11, %s676_s11   ;;  %s519_s10 = sphi %s556_s10, %s675_s10   ;;  %s515_s9 = sphi %s554_s9, %s674_s9  }
   0x5   : > { %s27_s17 = sadd.s32 1, %s531_s13  ;;  %s90_s18 = sadd.s32 1, %s523_s11 }
   0x6   : > { %p29_p0 = scmp.ge.s32.totalorder %s27_s17, 2  ;;  %p100_p1 = scmp.ne.s32.totalorder %s523_s11, %s519_s10 }
   0x7   : > { %p101_p2 = scmp.eq.s32.totalorder %s381_s15, 1  ;;  %p106_p3 = scmp.ne.s32.totalorder %s519_s10, %s515_s9 }
   0x8   : > { %s680_s17 = smov (%p29_p0, %s27_s17), 0  ;;  %p107_p5 = scmp.eq.s32.totalorder %s382_s16, 1 }
   0x9   : > { %p594_p4 = por %p101_p2, %p100_p1  ;;  %s85_s20 = ssub.s32 %s531_s13, %s680_s17 }
   0xa   : > { %p385_p6 = scmp.ge.s32.totalorder %s535_s14, 1  ;;  %p88_p7 = scmp.eq.s32.totalorder %s85_s20, 0 }
   0xb   : > { %p601_p8 = por %p107_p5, %p106_p3  ;;  %p145_p9 = scmp.lt.s32.totalorder %s535_s14, 3 }
   0xc   : > { %s607_s22 = scalar_select %p88_p7, %s523_s11, %s90_s18  }
   0xd   : > { %p146_p10 = pnand %p385_p6, %p145_p9 }
   0xe   : > { %p176_p11 = scmp.lt.s32.totalorder (!%p146_p10), %s527_s12, 1  ;;  %v537_v0 = vmov (!%p146_p10), 0.0   ;;  %vm198_vm0 = vcmask (!%p146_p10), 1043456   ;;  %vm194_vm1 = vcmask (!%p146_p10), 31744   ;;  %s172_s3 = sand.u32 (!%p146_p10), 1, %s519_s10  }
   0xf   : > { %149 = sbr.rel (%p146_p10) target bundleno = 258 (0x102), region = 28  ;;  %267 = vmatprep.mubr.f32.mxu0 (!%p146_p10), %v537_v0  ;;  %s386_s4 = sshll.u32 (!%p146_p10), %s172_s3, 4 }
  0x10   : > { %s174_s5 = scalar_lea.vmem (!%p146_p10), [#allocation2], %s386_s4  ;;  %s399_s7 = sshll.u32 (!%p146_p10), %s527_s12, 8 }
  0x11   : > { %s293_s6 = sshll.u32 (!%p146_p10), %s174_s5, 4  ;;  %s624_s16 = scalar_lea.hbm (!%p146_p10), %s671_s2, %s399_s7  ;;  %s619_s6 = int_to_ptr.vmem [resolvable:$true] %s293_s6 }
  0x12   : > { %s277_s18 = scalar_lea.sflag (!%p146_p10), [#allocation3], %s172_s3  ;;  %s457_s20 = scalar_lea.vmem (!%p146_p10), %s619_s6, 256 }
  0x13   : > { %p458_p12 = scmp.ne.s32.totalorder (!%p146_p10), %s619_s6, %s457_s20 }
  0x15   : > { %p459_p13 = pnand (!%p146_p10), %p458_p12, %p594_p4 }
  0x16   : > { %s177_s23 = scalar_select %p176_p11, %s527_s12, 1 }
  0x17   : > { %p460_p0 = pneg %p459_p13  ;;  %s538_s12 = smov [#allocation2]  }
  0x18   : > { %s398_s24 = sshll.u32 %s177_s23, 3  ;;  %s461_s23 = sshll.u32 %s538_s12, 4  ;;  %s462_s23 = int_to_ptr.vmem [resolvable:$false] %s461_s23 }
  0x19   : > { %s183_s27 = scalar_lea.vmem %s669_s0, %s398_s24  ;;  %s188_s30 = scalar_lea.vmem %s670_s1, %s398_s24 }
  0x1a   : > { %v190_v1 = vld [vmem:[%s183_s27] sm:$0xff]  ;;  %s463_s24 = scalar_lea.vmem %s462_s23, 512  ;;  %p464_p1 = scmp.lt.s32.totalorder %s619_s6, %s462_s23 }
  0x1b   : > { %v193_v2 = vcombine.high %v190_v1, %v190_v1  ;;  %v191_v3 = vld [vmem:[%s188_s30] sm:$0xff]  ;;  %p465_p2 = scmp.lt.s32.totalorder %s463_s24, %s457_s20 }
  0x1d   : > { %390 = vmatprep.subr.msk.mxu0 %vm198_vm0, %v193_v2  ;;  %p466_p3 = por %p465_p2, %p464_p1 }
  0x1e   : > { %391 = vmatpush1.msk.msra.mxu0 %vm198_vm0, %v190_v1 }
  0x1f   : > { %392 = vmatmul.mubr.msk.f32.vlgmr.msra.gmra.mrb[0].mxu0 %vm194_vm1, %v191_v3  ;;  %p467_p5 = pnand %p466_p3, %p460_p0 }
  0xf2   : > { %v269_v4 = vpop.f32.mrb[0].mxu0 }
  0xf3   : > { %274 = vst [vmem:[%s174_s5] sm:$0xff] %v269_v4  ;;  %v271_v5 = vpop.f32.mrb[1].mxu0 }
  0xf4   : > { %275 = vst [vmem:[%s174_s5 + $0x8] sm:$0xff] %v271_v5 }
  0xf5   : > { %470 = shalt.err (!%p467_p5)
}
  0xf6   : > { %s471_s25 = scalar_lea.hbm %s624_s16, 256  ;;  %s475_s28 = scalar_lea.hbm %s671_s2, 512 }
  0xf7   : > { %p472_p6 = scmp.ne.s32.totalorder %s624_s16, %s471_s25  ;;  %p476_p10 = scmp.lt.u32.totalorder %s624_s16, %s671_s2 }
  0xf8   : > { %p477_p11 = scmp.lt.u32.totalorder %s475_s28, %s471_s25  ;;  %p479_p13 = scmp.lt.u32.totalorder %s471_s25, %s624_s16 }
  0xf9   : > { %p473_p7 = pnand %p472_p6, %p594_p4 }
  0xfa   : > { %p478_p12 = por %p477_p11, %p476_p10 }
  0xfb   : > { %p474_p9 = pneg %p473_p7 }
  0xfc   : > { %p480_p0 = por %p479_p13, %p478_p12 }
  0xfe   : > { %p481_p1 = pnand %p480_p0, %p474_p9 }
 0x100   : > { %484 = shalt.err (!%p481_p1)
}
 0x101   : > { %400 = dma.vmem_to_hbm [thread:$0]  (%p594_p4), %s619_s6, 256, %s624_s16, %s277_s18  }
 0x102 PF: > { %p406_p2 = scmp.ge.s32.totalorder %s535_s14, 2  ;;  %s305_s3 = sand.u32 1, %s515_s9  }
 0x103   : > { %s306_s4 = scalar_lea.sflag [#allocation3], %s305_s3 }
 0x104   : > { %p403_p3 = pnand %p406_p2, %p601_p8 }
 0x106   : > { %510 = dma.done.wait (!%p403_p3), %s306_s4, 256  }
 0x107   : > { %512 = vsyncadd (!%p403_p3), %s306_s4, 4294967040  ;;  %s15_s14 = sadd.s32 1, %s535_s14   ;;  %s674_s9 = smov %s519_s10 }
 0x108   : > { %p12_p5 = scmp.ge.s32.totalorder %s15_s14, 4   ;;  %s675_s10 = smov %s523_s11 }
 0x109   : > { %s676_s11 = smov %s607_s22  ;;  %s677_s12 = smov %s531_s13 }
 0x10a   : > { %s678_s13 = smov %s680_s17  ;;  %14 = sbr.rel (!%p12_p5) target bundleno = 4 (0x4), region = 66 }
 0x111   :  { %311 = vsyncpa [#allocation3], 1 }
 0x112   :  { %313 = vsyncpa [#allocation3 + $0x1], 1 }

</bundles_post_ra>
